<compile_context>
chip_gen: v7x
topology: tpu7x:2x2x1
jax: 0.10.0
libtpu: 0.0.40
codegen_flags: <defaults>
</compile_context>

<pallas_src>
import functools

import jax
import jax.numpy as jnp
from jax import lax
from jax.experimental import pallas as pl
from jax.experimental.pallas import tpu as pltpu

BCE_WEIGHT = 0.2
DICE_WEIGHT = 0.8
SMOOTH = 1e-6

_ROW_TILE_CAP = 512                    # max rows (sublanes) per block
_SPLIT_MIN_ELEMS = 2 * 1024 * 1024     # below this, skip the dual-TC row split
_DEFAULT_VMEM_BYTES = 64 * 1024 * 1024  # conservative fallback (v7x per-core VMEM)


def _vmem_capacity_bytes():
    """Per-core VMEM capacity; falls back to the smallest (v7x) if unknown."""
    try:
        cap = getattr(pltpu.get_tpu_info(), "vmem_capacity_bytes", None)
        if cap:
            return int(cap)
    except Exception:
        pass
    return _DEFAULT_VMEM_BYTES


def _pick_fold(nc, hw):
    """Smallest g | hw making nc*g a multiple of 8 with a lane-aligned hw/g."""
    if nc % 8 == 0:
        return 1
    fallback = 1
    for g in range(2, 129):
        if hw % g or (nc * g) % 8:
            continue
        hw_f = hw // g
        if hw_f >= 128 and hw_f % 128 == 0:
            return g
        if fallback == 1 and hw_f >= 128:
            fallback = g
    return fallback


def _maybe_split_fold(nc, hw, g):
    """Fold further on large inputs so the parallel (row) axis ends up with
    >= 2 tiles (keeps both v7x TensorCores busy); no-op for small inputs."""
    if nc * hw < _SPLIT_MIN_ELEMS:
        return g
    rows, hw_f = nc * g, hw // g
    while rows < 16 and hw_f >= 2048 and hw_f % 256 == 0:
        g *= 2
        rows *= 2
        hw_f //= 2
    return g


def _pick_tile_rows(rows, total_elems, row_cap):
    if rows > row_cap:
        return row_cap                      # row_cap is a multiple of 8
    if rows <= 8 or total_elems < _SPLIT_MIN_ELEMS:
        return rows                         # one full-extent row tile
    # Large input with modest row count: >= 2 row tiles for v7x dual-TC.
    return max(8, (rows // 2) // 8 * 8)


def _pick_tile_hw(hw_f, tile_rows, tile_elems_max):
    cap = max(128, tile_elems_max // max(tile_rows, 1))
    if hw_f <= cap:
        return hw_f                         # single full-extent lane tile
    cap_tiles = cap // 128
    for m in range(cap_tiles, 0, -1):       # largest 128-multiple dividing hw_f
        if hw_f % (128 * m) == 0:
            return 128 * m
    return 128 * cap_tiles                  # tail handled by @pl.when-gated mask


def _bce_softdice_kernel(pred_ref, targ_ref, bce_ref, inter_ref, union_ref,
                         acc_bce, acc_inter, acc_union,
                         *, rows, hw_f, tile_rows, tile_hw):
    i = pl.program_id(0)                    # row tile ("parallel")
    k = pl.program_id(1)                    # hw tile  ("arbitrary" reduction)
    n_i = pl.num_programs(0)
    n_k = pl.num_programs(1)

    @pl.when(k == 0)
    def _init():
        acc_bce[...] = jnp.zeros_like(acc_bce)
        acc_inter[...] = jnp.zeros_like(acc_inter)
        acc_union[...] = jnp.zeros_like(acc_union)

    # Upcast on the VMEM tile (inputs may be bf16 / int in HBM).
    x = pred_ref[...].astype(jnp.float32)
    t = targ_ref[...].astype(jnp.float32)

    # One exp per element shared between BCE-with-logits and sigmoid:
    #   e        = exp(-|x|)
    #   bce_elem = max(x, 0) - x*t + log1p(e)          (numerically stable)
    #   sigmoid  = 1/(1+e) if x >= 0 else e/(1+e)
    e = jnp.exp(-jnp.abs(x))
    p_pos = 1.0 / (1.0 + e)
    p = jnp.where(x >= 0, p_pos, e * p_pos)
    bce_elem = jnp.maximum(x, 0.0) - x * t + jnp.log1p(e)
    pt = p * t
    un = p + t                              # sum(p)+sum(t) as a single reduction

    def _accumulate(b_e, pt_e, un_e):
        acc_bce[...] += jnp.sum(b_e, axis=1, keepdims=True)
        acc_inter[...] += jnp.sum(pt_e, axis=1, keepdims=True)
        acc_union[...] += jnp.sum(un_e, axis=1, keepdims=True)

    hw_tail = (hw_f % tile_hw) != 0         # static: only compiled in if needed
    row_tail = (rows % tile_rows) != 0

    if not hw_tail and not row_tail:
        _accumulate(bce_elem, pt, un)
    else:
        conds = []
        if hw_tail:
            conds.append(k == n_k - 1)
        if row_tail:
            conds.append(i == n_i - 1)
        is_tail = conds[0] if len(conds) == 1 else jnp.logical_or(*conds)

        @pl.when(jnp.logical_not(is_tail))
        def _full_tile():
            _accumulate(bce_elem, pt, un)

        @pl.when(is_tail)
        def _tail_tile():
            b_e, pt_e, un_e = bce_elem, pt, un
            if hw_tail:      # mask padded lanes with a (1, tile_hw) broadcast
                lane = lax.broadcasted_iota(jnp.int32, (1, tile_hw), 1)
                ok = (lane + k * tile_hw) < hw_f
                b_e = jnp.where(ok, b_e, 0.0)
                pt_e = jnp.where(ok, pt_e, 0.0)
                un_e = jnp.where(ok, un_e, 0.0)
            if row_tail:     # mask padded rows with a (tile_rows, 1) broadcast
                rid = lax.broadcasted_iota(jnp.int32, (tile_rows, 1), 0)
                ok = (rid + i * tile_rows) < rows
                b_e = jnp.where(ok, b_e, 0.0)
                pt_e = jnp.where(ok, pt_e, 0.0)
                un_e = jnp.where(ok, un_e, 0.0)
            _accumulate(b_e, pt_e, un_e)

    @pl.when(k == n_k - 1)
    def _finalize():
        bce_ref[...] = acc_bce[...]
        inter_ref[...] = acc_inter[...]
        union_ref[...] = acc_union[...]


def bce_softdice_loss(pred, target, bce_weight=BCE_WEIGHT, dice_weight=DICE_WEIGHT,
                      *, _tile_elems_max=None, _row_tile_cap=None):
    """Forward pass of BCESoftDiceLoss for NCHW pred/target.

    Preferred contract: keep pred/target in bfloat16 (or target in a narrow
    integer type) in HBM; the kernel upcasts per VMEM tile, so narrow inputs
    halve/quarter DMA traffic (biggest win on bandwidth-bound v5e).
    Returns a scalar float32 loss.
    """
    assert pred.shape == target.shape and pred.ndim == 4
    n, c, h, w = pred.shape
    nc, hw = n * c, h * w
    total = nc * hw

    # Fold spatial extent into the row axis: full sublane occupancy for small
    # N*C and >= 2 row tiles (v7x dual TensorCore) for large inputs.
    g = _maybe_split_fold(nc, hw, _pick_fold(nc, hw))
    rows, hw_f = nc * g, hw // g

    # Reshape only (free for contiguous NCHW); no dtype cast in the wrapper.
    pred2d = pred.reshape(rows, hw_f)
    targ2d = target.reshape(rows, hw_f)

    # Generation-aware tile budget: besides 2 inputs x 2 pipeline buffers, the
    # elementwise chain keeps several full-tile f32 temporaries live, so cap
    # the tile at ~VMEM/128 elements (2-4 MiB tiles: at the knee of the
    # measured HBM-roofline curve) and set the scoped VMEM limit from the
    # same hardware query.
    vmem_cap = _vmem_capacity_bytes()
    if _tile_elems_max is None:
        _tile_elems_max = min(max(vmem_cap // 128, 128 * 1024), 1024 * 1024)
    if _row_tile_cap is None:
        _row_tile_cap = _ROW_TILE_CAP
    vmem_limit = max(32 * 1024 * 1024, min((vmem_cap * 3) // 4, 100 * 1024 * 1024))

    tile_rows = _pick_tile_rows(rows, total, _row_tile_cap)
    tile_hw = _pick_tile_hw(hw_f, tile_rows, _tile_elems_max)
    n_i = pl.cdiv(rows, tile_rows)
    n_k = pl.cdiv(hw_f, tile_hw)

    kernel = functools.partial(_bce_softdice_kernel, rows=rows, hw_f=hw_f,
                               tile_rows=tile_rows, tile_hw=tile_hw)

    grid_spec = pltpu.PrefetchScalarGridSpec(
        num_scalar_prefetch=0,
        grid=(n_i, n_k),
        in_specs=[
            pl.BlockSpec((tile_rows, tile_hw), lambda i, k: (i, k)),
            pl.BlockSpec((tile_rows, tile_hw), lambda i, k: (i, k)),
        ],
        out_specs=[pl.BlockSpec((tile_rows, 1), lambda i, k: (i, 0))
                   for _ in range(3)],
        scratch_shapes=[
            pltpu.VMEM((tile_rows, 1), jnp.float32),   # bce row partials
            pltpu.VMEM((tile_rows, 1), jnp.float32),   # sum(p * t)
            pltpu.VMEM((tile_rows, 1), jnp.float32),   # sum(p) + sum(t)
        ],
    )

    rows_padded = n_i * tile_rows
    out_sds = jax.ShapeDtypeStruct((rows_padded, 1), jnp.float32)

    bce_rows, inter_rows, union_rows = pl.pallas_call(
        kernel,
        out_shape=(out_sds, out_sds, out_sds),
        grid_spec=grid_spec,
        compiler_params=pltpu.CompilerParams(
            dimension_semantics=("parallel", "arbitrary"),
            vmem_limit_bytes=vmem_limit),
    )(pred2d, targ2d)

    # Tiny cross-row tail (at most a few hundred floats) in plain JAX.
    bce_loss = jnp.sum(bce_rows[:rows, 0]) / total
    inter_nc = jnp.sum(inter_rows[:rows, 0].reshape(nc, g), axis=1)
    union_nc = jnp.sum(union_rows[:rows, 0].reshape(nc, g), axis=1)
    dice = jnp.mean((2.0 * inter_nc + SMOOTH) / (union_nc + SMOOTH))
    return bce_weight * bce_loss + dice_weight * (1.0 - dice)


def _reference(pred, target):
    x = pred.astype(jnp.float32)
    t = target.astype(jnp.float32)
    bce = jnp.mean(jnp.maximum(x, 0.0) - x * t + jnp.log1p(jnp.exp(-jnp.abs(x))))
    p = jax.nn.sigmoid(x)
    inter = jnp.sum(p * t, axis=(2, 3))
    union = jnp.sum(p, axis=(2, 3)) + jnp.sum(t, axis=(2, 3))
    dice = jnp.mean((2.0 * inter + SMOOTH) / (union + SMOOTH))
    return BCE_WEIGHT * bce + DICE_WEIGHT * (1.0 - dice)


if __name__ == "__main__":
    key = jax.random.PRNGKey(0)
    keys = jax.random.split(key, 8)

    def _check(pred, target, tol=1e-5, **kw):
        out = jax.block_until_ready(bce_softdice_loss(pred, target, **kw))
        ref = jax.block_until_ready(_reference(pred, target))
        assert jnp.allclose(out, ref, rtol=tol, atol=tol), (out, ref)

    # 1) Small canonical shape: single tile, rows already a multiple of 8.
    p1 = jax.random.normal(keys[0], (2, 4, 16, 16), dtype=jnp.float32)
    t1 = jax.random.bernoulli(keys[1], 0.5, (2, 4, 16, 16)).astype(jnp.float32)
    _check(p1, t1)

    # 2) nc=4: exercises the row-fold path (rows -> 8, hw_f -> 4608).
    p2 = jax.random.normal(keys[2], (1, 4, 96, 96), dtype=jnp.float32)
    t2 = jax.random.bernoulli(keys[3], 0.5, (1, 4, 96, 96)).astype(jnp.float32)
    _check(p2, t2)

    # 3) bf16 inputs (preferred HBM contract): kernel upcasts per tile.
    _check(p1.astype(jnp.bfloat16), t1.astype(jnp.bfloat16), tol=1e-4)

    # 4) Force a tiled HW reduction with a non-dividing tile so the
    #    @pl.when-gated lane tail-mask path runs (hw_f=400, tile_hw=128).
    p4 = jax.random.normal(keys[4], (1, 3, 20, 20), dtype=jnp.float32)
    t4 = jax.random.bernoulli(keys[5], 0.5, (1, 3, 20, 20)).astype(jnp.float32)
    _check(p4, t4, _tile_elems_max=3 * 128)

    # 5) Force >1 row tile with a row tail so the row-mask path runs
    #    (rows=24 after fold, tile_rows=16).
    p5 = jax.random.normal(keys[6], (2, 6, 16, 16), dtype=jnp.float32)
    t5 = jax.random.bernoulli(keys[7], 0.5, (2, 6, 16, 16)).astype(jnp.float32)
    _check(p5, t5, _row_tile_cap=16)

    print("KERNEL_OK")
</pallas_src>

<mosaic_0001>
module attributes {stable_mosaic.version = 11 : i64} {
  func.func @_bce_softdice_kernel(%arg0: i32, %arg1: i32, %arg2: memref<8x256xf32, #tpu.memory_space<vmem>>, %arg3: memref<8x256xf32, #tpu.memory_space<vmem>>, %arg4: memref<8x1xf32, #tpu.memory_space<vmem>>, %arg5: memref<8x1xf32, #tpu.memory_space<vmem>>, %arg6: memref<8x1xf32, #tpu.memory_space<vmem>>, %arg7: memref<8x1xf32, #tpu.memory_space<vmem>>, %arg8: memref<8x1xf32, #tpu.memory_space<vmem>>, %arg9: memref<8x1xf32, #tpu.memory_space<vmem>>) attributes {dimension_semantics = [#tpu.dimension_semantics<parallel>, #tpu.dimension_semantics<arbitrary>], iteration_bounds = array<i64: 1, 1>, scalar_prefetch = 0 : i64, scratch_operands = 3 : i64, tpu.core_type = #tpu.core_type<tc>, window_params = [{transform_indices = @transform_0, window_bounds = array<i64: 8, 256>}, {transform_indices = @transform_1, window_bounds = array<i64: 8, 256>}, {transform_indices = @transform_2, window_bounds = array<i64: 8, 1>}, {transform_indices = @transform_3, window_bounds = array<i64: 8, 1>}, {transform_indices = @transform_4, window_bounds = array<i64: 8, 1>}]} {
    %c0_i32 = arith.constant 0 : i32
    %0 = arith.cmpi eq, %arg1, %c0_i32 : i32
    %1 = arith.extui %0 : i1 to i32
    %c0_i32_0 = arith.constant 0 : i32
    %2 = arith.cmpi ne, %1, %c0_i32_0 : i32
    scf.if %2 {
      %cst_25 = arith.constant 0.000000e+00 : f32
      %43 = vector.broadcast %cst_25 : f32 to vector<8x1xf32>
      %c0_26 = arith.constant 0 : index
      %c0_27 = arith.constant 0 : index
      %44 = vector.load %arg7[%c0_26, %c0_27] : memref<8x1xf32, #tpu.memory_space<vmem>>, vector<8x1xf32>
      tpu.vector_store %arg7[%c0_26, %c0_27], %43 {strides = array<i32>} : memref<8x1xf32, #tpu.memory_space<vmem>>, vector<8x1xf32>,
      %cst_28 = arith.constant 0.000000e+00 : f32
      %45 = vector.broadcast %cst_28 : f32 to vector<8x1xf32>
      %c0_29 = arith.constant 0 : index
      %c0_30 = arith.constant 0 : index
      %46 = vector.load %arg8[%c0_29, %c0_30] : memref<8x1xf32, #tpu.memory_space<vmem>>, vector<8x1xf32>
      tpu.vector_store %arg8[%c0_29, %c0_30], %45 {strides = array<i32>} : memref<8x1xf32, #tpu.memory_space<vmem>>, vector<8x1xf32>,
      %cst_31 = arith.constant 0.000000e+00 : f32
      %47 = vector.broadcast %cst_31 : f32 to vector<8x1xf32>
      %c0_32 = arith.constant 0 : index
      %c0_33 = arith.constant 0 : index
      %48 = vector.load %arg9[%c0_32, %c0_33] : memref<8x1xf32, #tpu.memory_space<vmem>>, vector<8x1xf32>
      tpu.vector_store %arg9[%c0_32, %c0_33], %47 {strides = array<i32>} : memref<8x1xf32, #tpu.memory_space<vmem>>, vector<8x1xf32>,
    } else {
    }
    %c0 = arith.constant 0 : index
    %c0_1 = arith.constant 0 : index
    %3 = vector.load %arg2[%c0, %c0_1] : memref<8x256xf32, #tpu.memory_space<vmem>>, vector<8x256xf32>
    %c0_2 = arith.constant 0 : index
    %c0_3 = arith.constant 0 : index
    %4 = vector.load %arg3[%c0_2, %c0_3] : memref<8x256xf32, #tpu.memory_space<vmem>>, vector<8x256xf32>
    %5 = math.absf %3 : vector<8x256xf32>
    %cst = arith.constant 0.000000e+00 : f32
    %6 = vector.broadcast %cst : f32 to vector<8x256xf32>
    %7 = arith.subf %6, %5 : vector<8x256xf32>
    %8 = math.exp %7 : vector<8x256xf32>
    %cst_4 = arith.constant 1.000000e+00 : f32
    %9 = vector.broadcast %cst_4 : f32 to vector<8x256xf32>
    %10 = arith.addf %9, %8 : vector<8x256xf32>
    %cst_5 = arith.constant 1.000000e+00 : f32
    %11 = vector.broadcast %cst_5 : f32 to vector<8x256xf32>
    %12 = arith.divf %11, %10 : vector<8x256xf32>
    %cst_6 = arith.constant 0.000000e+00 : f32
    %13 = vector.broadcast %cst_6 : f32 to vector<8x256xf32>
    %14 = arith.cmpf oge, %3, %13 : vector<8x256xf32>
    %15 = arith.mulf %8, %12 : vector<8x256xf32>
    %16 = arith.select %14, %12, %15 : vector<8x256xi1>, vector<8x256xf32>
    %cst_7 = arith.constant 0.000000e+00 : f32
    %17 = vector.broadcast %cst_7 : f32 to vector<8x256xf32>
    %18 = arith.maximumf %3, %17 : vector<8x256xf32>
    %19 = arith.mulf %3, %4 : vector<8x256xf32>
    %20 = arith.subf %18, %19 : vector<8x256xf32>
    %21 = math.log1p %8 : vector<8x256xf32>
    %22 = arith.addf %20, %21 : vector<8x256xf32>
    %23 = arith.mulf %16, %4 : vector<8x256xf32>
    %24 = arith.addf %16, %4 : vector<8x256xf32>
    %c0_8 = arith.constant 0 : index
    %c0_9 = arith.constant 0 : index
    %25 = vector.load %arg7[%c0_8, %c0_9] : memref<8x1xf32, #tpu.memory_space<vmem>>, vector<8x1xf32>
    %cst_10 = arith.constant dense<0.000000e+00> : vector<8xf32>
    %26 = vector.multi_reduction <add>, %22, %cst_10 [1] : vector<8x256xf32> to vector<8xf32>
    %27 = vector.shape_cast %26 : vector<8xf32> to vector<8x1xf32>
    %28 = arith.addf %25, %27 : vector<8x1xf32>
    %c0_11 = arith.constant 0 : index
    %c0_12 = arith.constant 0 : index
    %29 = vector.load %arg7[%c0_11, %c0_12] : memref<8x1xf32, #tpu.memory_space<vmem>>, vector<8x1xf32>
    tpu.vector_store %arg7[%c0_11, %c0_12], %28 {strides = array<i32>} : memref<8x1xf32, #tpu.memory_space<vmem>>, vector<8x1xf32>,
    %c0_13 = arith.constant 0 : index
    %c0_14 = arith.constant 0 : index
    %30 = vector.load %arg8[%c0_13, %c0_14] : memref<8x1xf32, #tpu.memory_space<vmem>>, vector<8x1xf32>
    %cst_15 = arith.constant dense<0.000000e+00> : vector<8xf32>
    %31 = vector.multi_reduction <add>, %23, %cst_15 [1] : vector<8x256xf32> to vector<8xf32>
    %32 = vector.shape_cast %31 : vector<8xf32> to vector<8x1xf32>
    %33 = arith.addf %30, %32 : vector<8x1xf32>
    %c0_16 = arith.constant 0 : index
    %c0_17 = arith.constant 0 : index
    %34 = vector.load %arg8[%c0_16, %c0_17] : memref<8x1xf32, #tpu.memory_space<vmem>>, vector<8x1xf32>
    tpu.vector_store %arg8[%c0_16, %c0_17], %33 {strides = array<i32>} : memref<8x1xf32, #tpu.memory_space<vmem>>, vector<8x1xf32>,
    %c0_18 = arith.constant 0 : index
    %c0_19 = arith.constant 0 : index
    %35 = vector.load %arg9[%c0_18, %c0_19] : memref<8x1xf32, #tpu.memory_space<vmem>>, vector<8x1xf32>
    %cst_20 = arith.constant dense<0.000000e+00> : vector<8xf32>
    %36 = vector.multi_reduction <add>, %24, %cst_20 [1] : vector<8x256xf32> to vector<8xf32>
    %37 = vector.shape_cast %36 : vector<8xf32> to vector<8x1xf32>
    %38 = arith.addf %35, %37 : vector<8x1xf32>
    %c0_21 = arith.constant 0 : index
    %c0_22 = arith.constant 0 : index
    %39 = vector.load %arg9[%c0_21, %c0_22] : memref<8x1xf32, #tpu.memory_space<vmem>>, vector<8x1xf32>
    tpu.vector_store %arg9[%c0_21, %c0_22], %38 {strides = array<i32>} : memref<8x1xf32, #tpu.memory_space<vmem>>, vector<8x1xf32>,
    %c0_i32_23 = arith.constant 0 : i32
    %40 = arith.cmpi eq, %arg1, %c0_i32_23 : i32
    %41 = arith.extui %40 : i1 to i32
    %c0_i32_24 = arith.constant 0 : i32
    %42 = arith.cmpi ne, %41, %c0_i32_24 : i32
    scf.if %42 {
      %c0_25 = arith.constant 0 : index
      %c0_26 = arith.constant 0 : index
      %43 = vector.load %arg7[%c0_25, %c0_26] : memref<8x1xf32, #tpu.memory_space<vmem>>, vector<8x1xf32>
      %c0_27 = arith.constant 0 : index
      %c0_28 = arith.constant 0 : index
      %44 = vector.load %arg4[%c0_27, %c0_28] : memref<8x1xf32, #tpu.memory_space<vmem>>, vector<8x1xf32>
      tpu.vector_store %arg4[%c0_27, %c0_28], %43 {strides = array<i32>} : memref<8x1xf32, #tpu.memory_space<vmem>>, vector<8x1xf32>,
      %c0_29 = arith.constant 0 : index
      %c0_30 = arith.constant 0 : index
      %45 = vector.load %arg8[%c0_29, %c0_30] : memref<8x1xf32, #tpu.memory_space<vmem>>, vector<8x1xf32>
      %c0_31 = arith.constant 0 : index
      %c0_32 = arith.constant 0 : index
      %46 = vector.load %arg5[%c0_31, %c0_32] : memref<8x1xf32, #tpu.memory_space<vmem>>, vector<8x1xf32>
      tpu.vector_store %arg5[%c0_31, %c0_32], %45 {strides = array<i32>} : memref<8x1xf32, #tpu.memory_space<vmem>>, vector<8x1xf32>,
      %c0_33 = arith.constant 0 : index
      %c0_34 = arith.constant 0 : index
      %47 = vector.load %arg9[%c0_33, %c0_34] : memref<8x1xf32, #tpu.memory_space<vmem>>, vector<8x1xf32>
      %c0_35 = arith.constant 0 : index
      %c0_36 = arith.constant 0 : index
      %48 = vector.load %arg6[%c0_35, %c0_36] : memref<8x1xf32, #tpu.memory_space<vmem>>, vector<8x1xf32>
      tpu.vector_store %arg6[%c0_35, %c0_36], %47 {strides = array<i32>} : memref<8x1xf32, #tpu.memory_space<vmem>>, vector<8x1xf32>,
    } else {
    }
    return
  }
  func.func @transform_0(%arg0: i32, %arg1: i32) -> (i32, i32) {
    %c0_i32 = arith.constant 0 : i32
    return %arg0, %arg1 : i32, i32
  }
  func.func @transform_1(%arg0: i32, %arg1: i32) -> (i32, i32) {
    %c0_i32 = arith.constant 0 : i32
    return %arg0, %arg1 : i32, i32
  }
  func.func @transform_2(%arg0: i32, %arg1: i32) -> (i32, i32) {
    %c0_i32 = arith.constant 0 : i32
    %c0_i32_0 = arith.constant 0 : i32
    return %arg0, %c0_i32 : i32, i32
  }
  func.func @transform_3(%arg0: i32, %arg1: i32) -> (i32, i32) {
    %c0_i32 = arith.constant 0 : i32
    %c0_i32_0 = arith.constant 0 : i32
    return %arg0, %c0_i32 : i32, i32
  }
  func.func @transform_4(%arg0: i32, %arg1: i32) -> (i32, i32) {
    %c0_i32 = arith.constant 0 : i32
    %c0_i32_0 = arith.constant 0 : i32
    return %arg0, %c0_i32 : i32, i32
  }
}

</mosaic_0001>

<bundles_post_ra>
// kernel: tpu_custom_call.1
= control target key start
LH: loop header
LB: loop body
LE: loop exit
PB: predicated region body
PF: predicated region fallthrough
CT: control target
= control target key end

     0   :  { %10 = vsyncpa [#allocation6], 0  ;;  %s275_s0 = inlined_call_operand.hbm [shape: f32[8,256], index: 0, kind: input, shape index: {}]   ;;  %s276_s1 = inlined_call_operand.hbm [shape: f32[8,256], index: 1, kind: input, shape index: {}]   ;;  %s277_s2 = inlined_call_operand.vmem [shape: f32[8,1], index: 2, kind: output, shape index: {0}]   ;;  %s278_s3 = inlined_call_operand.vmem [shape: f32[8,1], index: 3, kind: output, shape index: {1}]   ;;  %s279_s4 = inlined_call_operand.vmem [shape: f32[8,1], index: 4, kind: output, shape index: {2}]  }
   0x1   :  { %11 = vsyncpa [#allocation8], 0  ;;  %s205_s15 = smov [#allocation5]   ;;  %s206_s17 = smov [#allocation7]  }
   0x2   :  { %s18_s16 = sshll.u32 %s205_s15, 4  ;;  %s28_s18 = sshll.u32 %s206_s17, 4  ;;  %s19_s16 = int_to_ptr.vmem [resolvable:$true] %s18_s16  ;;  %s29_s18 = int_to_ptr.vmem [resolvable:$true] %s28_s18 }
   0x3   :  { %s157_s21 = scalar_lea.hbm %s275_s0, 256 }
   0x4   :  { %p158_p0 = scmp.ne.s32.totalorder %s275_s0, %s157_s21  ;;  %p161_p1 = scmp.lt.u32.totalorder %s157_s21, %s275_s0 }
   0x6   :  { %p163_p2 = pnand %p161_p1, %p158_p0 }
   0x8   :  { %166 = shalt.err (!%p163_p2)
}
   0x9   :  { %s167_s26 = scalar_lea.vmem %s19_s16, 256  ;;  %p172_p4 = scmp.lt.s32.totalorder %s19_s16, %s19_s16 }
   0xa   :  { %p168_p3 = scmp.ne.s32.totalorder %s19_s16, %s167_s26  ;;  %p173_p5 = scmp.lt.s32.totalorder %s167_s26, %s167_s26 }
   0xc   :  { %p174_p6 = por %p173_p5, %p172_p4 }
   0xe   :  { %p175_p7 = pnand %p174_p6, %p168_p3 }
  0x10   :  { %178 = shalt.err (!%p175_p7)
}
  0x11   :  { %21 = dma.hbm_to_vmem [thread:$0]  %s275_s0, 256, %s19_s16, [#allocation6]  }
  0x12   :  { %s179_s5 = scalar_lea.hbm %s276_s1, 256 }
  0x13   :  { %p180_p8 = scmp.ne.s32.totalorder %s276_s1, %s179_s5  ;;  %p183_p9 = scmp.lt.u32.totalorder %s179_s5, %s276_s1 }
  0x15   :  { %p185_p10 = pnand %p183_p9, %p180_p8 }
  0x17   :  { %188 = shalt.err (!%p185_p10)
}
  0x18   :  { %s189_s10 = scalar_lea.vmem %s29_s18, 256  ;;  %p194_p12 = scmp.lt.s32.totalorder %s29_s18, %s29_s18 }
  0x19   :  { %p190_p11 = scmp.ne.s32.totalorder %s29_s18, %s189_s10  ;;  %p195_p13 = scmp.lt.s32.totalorder %s189_s10, %s189_s10 }
  0x1b   :  { %p196_p0 = por %p195_p13, %p194_p12 }
  0x1d   :  { %p197_p1 = pnand %p196_p0, %p190_p11 }
  0x1f   :  { %200 = shalt.err (!%p197_p1)
}
  0x20   :  { %31 = dma.hbm_to_vmem [thread:$0]  %s276_s1, 256, %s29_s18, [#allocation8]  }
  0x21   :  { %201 = dma.done.wait [#allocation6], 256  }
  0x22   :  { %202 = vsyncadd [#allocation6], 4294967040 }
  0x23   :  { %203 = dma.done.wait [#allocation8], 256  }
  0x24   :  { %204 = vsyncadd [#allocation8], 4294967040  ;;  %vm42_vm0 = vcmask 7168   ;;  %v207_v0 = vmov 0.0   ;;  %v46_v1 = vld [vmem:[#allocation5] sm:$0xff]  ;;  %v47_v2 = vld [vmem:[#allocation5 + $0x8] sm:$0xff] }
  0x25   :  { %43 = vst.msk [vmem:[#allocation2] sm:$0xff] %vm42_vm0, %v207_v0  ;;  %44 = vst.msk [vmem:[#allocation3] sm:$0xff] %vm42_vm0, %v207_v0  ;;  %v50_v3 = vand.u32 2147483647, %v46_v1  ;;  %v51_v4 = vand.u32 2147483647, %v47_v2 }
  0x26   :  { %45 = vst.msk [vmem:[#allocation4] sm:$0xff] %vm42_vm0, %v207_v0  ;;  %v48_v14 = vld [vmem:[#allocation7] sm:$0xff]  ;;  %v49_v16 = vld [vmem:[#allocation7 + $0x8] sm:$0xff]  ;;  %v70_v18 = vmax.f32 %v46_v1, 0.0  ;;  %v71_v22 = vmax.f32 %v47_v2, 0.0  ;;  %vm65_vm2 = vcmp.ge.f32.partialorder %v47_v2, 0.0 }
  0x27   :  { %v52_v5 = vsub.f32 0.0, %v50_v3  ;;  %v53_v6 = vsub.f32 0.0, %v51_v4  ;;  %v72_v19 = vmul.f32 %v48_v14, %v46_v1  ;;  %v73_v23 = vmul.f32 %v49_v16, %v47_v2 }
  0x28   :  { %vm64_vm4 = vcmp.ge.f32.partialorder %v46_v1, 0.0 }
  0x29   :  { %v54_v7 = vmul.f32 1.442695, %v52_v5  ;;  %v56_v8 = vmul.f32 1.442695, %v53_v6  ;;  %v74_v27 = vsub.f32 %v70_v18, %v72_v19  ;;  %v75_v32 = vsub.f32 %v71_v22, %v73_v23 }
  0x2b   :  { %145 = vpow2.f32 %v54_v7 }
  0x2c   :  { %147 = vpow2.f32 %v56_v8  ;;  %v100_v50 = vld [vmem:[#allocation2] sm:$0xff]  ;;  %v107_v56 = vld [vmem:[#allocation3] sm:$0xff] }
  0x2d   :  { %v113_v51 = vld [vmem:[#allocation4] sm:$0xff] }
  0x35   :  { %v146_v9 = vpop.eup %145 }
  0x36   :  { %v148_v10 = vpop.eup %147  ;;  %v58_v11 = vadd.f32 1.0, %v146_v9  ;;  %v79_v13 = vmul.f32 -0.5, %v146_v9  ;;  %v82_v20 = vand.u32 2147483647, %v146_v9 }
  0x37   :  { %v59_v12 = vadd.f32 1.0, %v148_v10  ;;  %v88_v15 = vmul.f32 -0.5, %v148_v10  ;;  %v91_v24 = vand.u32 2147483647, %v148_v10 }
  0x38   :  { %149 = vlog2.f32 %v58_v11  ;;  %v80_v17 = vadd.f32 1.0, %v79_v13  ;;  %vm83_vm1 = vcmp.lt.f32.partialorder %v82_v20, 0.0004427343 }
  0x39   :  { %151 = vrcp.f32 %v59_v12  ;;  %v89_v21 = vadd.f32 1.0, %v88_v15  ;;  %vm92_vm3 = vcmp.lt.f32.partialorder %v91_v24, 0.0004427343 }
  0x3a   :  { %153 = vlog2.f32 %v59_v12  ;;  %v81_v25 = vmul.f32 %v146_v9, %v80_v17 }
  0x3b   :  { %155 = vrcp.f32 %v58_v11  ;;  %v90_v30 = vmul.f32 %v148_v10, %v89_v21 }
  0x42   :  { %v150_v26 = vpop.eup %149 }
  0x43   :  { %v152_v28 = vpop.eup %151  ;;  %v78_v29 = vmul.f32 0.6931472, %v150_v26 }
  0x44   :  { %v154_v31 = vpop.eup %153  ;;  %v67_v33 = vmul.f32 %v152_v28, %v148_v10 }
  0x45   :  { %v156_v34 = vpop.eup %155  ;;  %v84_v35 = vsel %vm83_vm1, %v81_v25, %v78_v29  ;;  %v87_v36 = vmul.f32 0.6931472, %v154_v31 }
  0x46   :  { %v94_v37 = vadd.f32 %v84_v35, %v74_v27  ;;  %v66_v38 = vmul.f32 %v156_v34, %v146_v9  ;;  %v69_v39 = vsel %vm65_vm2, %v152_v28, %v67_v33 }
  0x47   :  { %v93_v40 = vsel %vm92_vm3, %v90_v30, %v87_v36  ;;  %v99_v41 = vadd.f32 %v69_v39, %v49_v16  ;;  %v97_v44 = vmul.f32 %v69_v39, %v49_v16 }
  0x48   :  { %v95_v42 = vadd.f32 %v93_v40, %v75_v32  ;;  %v68_v43 = vsel %vm64_vm4, %v156_v34, %v66_v38 }
  0x49   :  { %v98_v45 = vadd.f32 %v68_v43, %v48_v14  ;;  %v96_v46 = vmul.f32 %v68_v43, %v48_v14 }
  0x4a   :  { %v101_v47 = vadd.f32 %v95_v42, %v94_v37 }
  0x4b   :  { %v114_v48 = vadd.f32 %v99_v41, %v98_v45  ;;  %v108_v49 = vadd.f32 %v97_v44, %v96_v46 }
  0x4c   :  { %102 = vadd.xlane.f32.xlu0 %v101_v47 }
  0x4d   :  { %115 = vadd.xlane.f32.xlu1 %v114_v48 }
  0x50   :  { %109 = vadd.xlane.f32.xlu0 %v108_v49 }
  0xd9   :  { %v103_v52 = vpop.xlane.xlu0 %102 }
  0xda   :  { %v104_v53 = vadd.f32 %v103_v52, %v100_v50  ;;  %v116_v54 = vpop.xlane.xlu1 %115 }
  0xdb   :  { %v117_v55 = vadd.f32 %v116_v54, %v113_v51 }
  0xdc   :  { %106 = vst.msk [vmem:[#allocation2] sm:$0xff] %vm42_vm0, %v104_v53 }
  0xdd   :  { %118 = vst.msk [vmem:[#allocation4] sm:$0xff] %vm42_vm0, %v117_v55  ;;  %v110_v57 = vpop.xlane.xlu0 %109 }
  0xde   :  { %v111_v58 = vadd.f32 %v110_v57, %v107_v56 }
  0xe0   :  { %112 = vst.msk [vmem:[#allocation3] sm:$0xff] %vm42_vm0, %v111_v58 }
  0xe3   :  { %v122_v59 = vld [vmem:[#allocation2] sm:$0xff] }
  0xe4   :  { %123 = vst.msk [vmem:[%s277_s2] sm:$0xff] %vm42_vm0, %v122_v59  ;;  %v126_v60 = vld [vmem:[#allocation4] sm:$0xff] }
  0xe5   :  { %127 = vst.msk [vmem:[%s279_s4] sm:$0xff] %vm42_vm0, %v126_v60 }
  0xe7   :  { %v124_v61 = vld [vmem:[#allocation3] sm:$0xff] }
  0xe8   :  { %125 = vst.msk [vmem:[%s278_s3] sm:$0xff] %vm42_vm0, %v124_v61 }
  0xe9   :  { %140 = vsyncpa [#allocation6], 1 }
  0xea   :  { %141 = vsyncpa [#allocation8], 1 }

</bundles_post_ra>
